<compile_context>
chip_gen: v7x
topology: tpu7x:2x2x1
jax: 0.10.0
libtpu: 0.0.40
codegen_flags: <defaults>
</compile_context>

<pallas_src>
import jax
import jax.numpy as jnp
from jax.experimental import pallas as pl
from jax.experimental.pallas import tpu as pltpu


def _make_dice_sums_kernel(hw, tb, n_classes, ragged):
    """Kernel closed over static H*W, slabs-per-tile, C and the ragged flag."""

    def kernel(x_ref, t_ref, pt_ref, st_ref, pp_ref):
        # x_ref : (Nb, C, tb, 8, 128) logits block (input dtype)
        # t_ref : (Nb, 1, tb, 8, 128) int32 class labels block
        # pt/st/pp_ref : (1, C, 8, 128) f32 per-batch-block partial sums of
        #                p*onehot, onehot, p*p (lane/sublane reduce in wrapper)
        r = pl.program_id(1)

        @pl.when(r == 0)
        def _init():
            pt_ref[...] = jnp.zeros_like(pt_ref)
            st_ref[...] = jnp.zeros_like(st_ref)
            pp_ref[...] = jnp.zeros_like(pp_ref)

        x = x_ref[...].astype(jnp.float32)          # (Nb, C, tb, 8, 128)
        lab = t_ref[...][:, 0]                      # (Nb, tb, 8, 128) int32

        if ragged:
            # Only emitted when the covered extent != H*W (padded tail and/or
            # a last ragged slab-tile).  Mask garbage/padding before softmax.
            slab_i = jax.lax.broadcasted_iota(jnp.int32, (tb, 8, 128), 0)
            row_i = jax.lax.broadcasted_iota(jnp.int32, (tb, 8, 128), 1)
            lane_i = jax.lax.broadcasted_iota(jnp.int32, (tb, 8, 128), 2)
            gidx = ((r * tb + slab_i) * 8 + row_i) * 128 + lane_i
            mask = gidx < hw                        # (tb, 8, 128)
            x = jnp.where(mask[None, None], x, 0.0)
        else:
            mask = None

        # Softmax over the class axis: elementwise max/add across C slabs
        # (full-occupancy VPU), exp on the EUP, one reciprocal per pixel.
        m = jnp.max(x, axis=1)                      # (Nb, tb, 8, 128)
        e = jnp.exp(x - m[:, None])                 # (Nb, C, tb, 8, 128)
        denom = jnp.sum(e, axis=1)                  # (Nb, tb, 8, 128)
        rinv = pl.reciprocal(denom, approx=False)   # precise: matches reference

        for c in range(n_classes):                  # static unroll, C is small
            p_c = e[:, c] * rinv                    # (Nb, tb, 8, 128)
            hot = lab == c
            p2 = p_c * p_c
            if ragged:
                hot = jnp.logical_and(hot, mask[None])
                p2 = jnp.where(mask[None], p2, 0.0)
            hot_f = hot.astype(jnp.float32)
            # Reduce only over batch/slab axes (elementwise vreg adds) and
            # accumulate into the resident (8,128) per-class output slab.
            pt_ref[0, c] = pt_ref[0, c] + jnp.sum(p_c * hot_f, axis=(0, 1))
            st_ref[0, c] = st_ref[0, c] + jnp.sum(hot_f, axis=(0, 1))
            pp_ref[0, c] = pp_ref[0, c] + jnp.sum(p2, axis=(0, 1))

    return kernel


def dice_loss_pallas(logits, target, weight=None, softmax=True, *,
                     max_slabs_per_step=64,
                     vmem_budget_bytes=20 * 1024 * 1024):
    """logits: (N, C, H, W). target: (N, 1, H, W) class labels (int or float)."""
    # TODO(synk): softmax=False path (caller passes pre-softmaxed probs) not implemented.
    assert softmax, "This kernel implements the softmax=True path of DiceLoss."
    N, C, H, W = logits.shape
    HW = H * W
    SLAB = 8 * 128

    x = logits.reshape(N, C, HW)                    # metadata-only reshape
    t = target.reshape(N, 1, HW).astype(jnp.int32)

    hw_pad = ((HW + SLAB - 1) // SLAB) * SLAB
    if hw_pad != HW:
        # Rare (H*W not a multiple of 1024): one pad copy so the (.., 8, 128)
        # layout exists.  Padded pixels are masked out inside the kernel.
        x = jnp.pad(x, ((0, 0), (0, 0), (0, hw_pad - HW)))
        t = jnp.pad(t, ((0, 0), (0, 0), (0, hw_pad - HW)))
    r8 = hw_pad // SLAB

    x5 = x.reshape(N, C, r8, 8, 128)
    t5 = t.reshape(N, 1, r8, 8, 128)

    # ---- tile sizing: biggest block that fits the VMEM budget --------------
    x_item = jnp.dtype(x5.dtype).itemsize
    # per (8,128) slab: double-buffered inputs (C logits planes + 1 label
    # plane) + f32 intermediates (upcast x, e, m/denom/rinv, per-class temps)
    bytes_per_slab = SLAB * (2 * (C * x_item + 4) + 4 * (2 * C + 6))
    slab_cap = max(1, vmem_budget_bytes // bytes_per_slab)
    tb_target = int(min(max_slabs_per_step, slab_cap))

    if r8 > tb_target:
        nb = 1
        tb = tb_target
        # prefer a slab count that divides r8 so no ragged masking is emitted
        for cand in range(tb_target, max(1, tb_target // 2) - 1, -1):
            if r8 % cand == 0:
                tb = cand
                break
    else:
        # whole image fits one tile: fold batch elements into the block
        tb = r8
        nb = int(min(N, max(1, tb_target // r8)))
        while N % nb:
            nb -= 1

    n_bblk = N // nb
    n_rblk = pl.cdiv(r8, tb)
    ragged = (n_rblk * tb * SLAB) != HW

    kernel = _make_dice_sums_kernel(HW, tb, C, ragged)

    npix = N * HW
    cost = pl.CostEstimate(
        flops=8 * npix * C,
        transcendentals=npix * (C + 1),
        bytes_accessed=int(N * hw_pad * (C * x_item + 4)
                           + 3 * n_bblk * C * SLAB * 4),
    )

    out_sds = jax.ShapeDtypeStruct((n_bblk, C, 8, 128), jnp.float32)
    out_spec = pl.BlockSpec((1, C, 8, 128), lambda n, r: (n, 0, 0, 0))

    s_pt, s_t, s_pp = pl.pallas_call(
        kernel,
        out_shape=(out_sds, out_sds, out_sds),
        grid_spec=pltpu.PrefetchScalarGridSpec(
            num_scalar_prefetch=0,
            grid=(n_bblk, n_rblk),
            in_specs=[
                pl.BlockSpec((nb, C, tb, 8, 128), lambda n, r: (n, 0, r, 0, 0)),
                pl.BlockSpec((nb, 1, tb, 8, 128), lambda n, r: (n, 0, r, 0, 0)),
            ],
            out_specs=(out_spec, out_spec, out_spec),
        ),
        compiler_params=pltpu.CompilerParams(
            # batch-block axis is independent (per-block outputs) -> parallel
            # (uses both v7x TensorCores); slab axis accumulates -> arbitrary.
            dimension_semantics=("parallel", "arbitrary"),
            vmem_limit_bytes=32 * 1024 * 1024),
        cost_estimate=cost,
    )(x5, t5)

    # tiny final reductions + dice combination: plain-JAX glue
    sum_pt = jnp.sum(s_pt, axis=(0, 2, 3))
    sum_t = jnp.sum(s_t, axis=(0, 2, 3))
    sum_pp = jnp.sum(s_pp, axis=(0, 2, 3))

    if weight is None:
        w = jnp.ones((C,), jnp.float32)
    else:
        w = jnp.asarray(weight, jnp.float32)

    smooth = 0.0001
    dice = (2.0 * sum_pt + smooth) / (sum_t + sum_pp + smooth)
    return jnp.sum((1.0 - dice) * w) / C


def dice_loss_reference(logits, target, weight=None):
    """Pure-JAX reference matching the PyTorch module."""
    N, C, H, W = logits.shape
    p = jax.nn.softmax(logits.astype(jnp.float32), axis=1)
    t = target.astype(jnp.float32)
    onehot = jnp.concatenate(
        [(t == i).astype(jnp.float32) for i in range(C)], axis=1)
    if weight is None:
        weight = [1.0] * C
    smooth = 0.0001
    loss = 0.0
    for i in range(C):
        pi, ti = p[:, i], onehot[:, i]
        inter = jnp.sum(pi * ti)
        dice = (2 * inter + smooth) / (jnp.sum(ti) + jnp.sum(pi * pi) + smooth)
        loss = loss + (1.0 - dice) * weight[i]
    return loss / C


if __name__ == "__main__":
    key = jax.random.PRNGKey(0)
    k1, k2 = jax.random.split(key)
    N, C, H, W = 2, 4, 16, 16
    logits = jax.random.normal(k1, (N, C, H, W), dtype=jnp.float32)
    target = jax.random.randint(k2, (N, 1, H, W), 0, C).astype(jnp.float32)

    loss = dice_loss_pallas(logits, target)
    loss = jax.block_until_ready(loss)

    ref = dice_loss_reference(logits, target)
    assert jnp.allclose(loss, ref, atol=1e-4, rtol=1e-4), (loss, ref)
    print("KERNEL_OK")
</pallas_src>

<mosaic_0001>
module attributes {stable_mosaic.version = 11 : i64} {
  func.func @kernel(%arg0: i32, %arg1: i32, %arg2: memref<2x4x1x8x128xf32, #tpu.memory_space<vmem>>, %arg3: memref<2x1x1x8x128xi32, #tpu.memory_space<vmem>>, %arg4: memref<1x4x8x128xf32, #tpu.memory_space<vmem>>, %arg5: memref<1x4x8x128xf32, #tpu.memory_space<vmem>>, %arg6: memref<1x4x8x128xf32, #tpu.memory_space<vmem>>) attributes {dimension_semantics = [#tpu.dimension_semantics<parallel>, #tpu.dimension_semantics<arbitrary>], iteration_bounds = array<i64: 1, 1>, scalar_prefetch = 0 : i64, scratch_operands = 0 : i64, tpu.core_type = #tpu.core_type<tc>, window_params = [{transform_indices = @transform_0, window_bounds = array<i64: 2, 4, 1, 8, 128>}, {transform_indices = @transform_1, window_bounds = array<i64: 2, 1, 1, 8, 128>}, {transform_indices = @transform_2, window_bounds = array<i64: 1, 4, 8, 128>}, {transform_indices = @transform_3, window_bounds = array<i64: 1, 4, 8, 128>}, {transform_indices = @transform_4, window_bounds = array<i64: 1, 4, 8, 128>}]} {
    %c0_i32 = arith.constant 0 : i32
    %0 = arith.cmpi eq, %arg1, %c0_i32 : i32
    %1 = arith.extui %0 : i1 to i32
    %c0_i32_0 = arith.constant 0 : i32
    %2 = arith.cmpi ne, %1, %c0_i32_0 : i32
    scf.if %2 {
      %cst_123 = arith.constant 0.000000e+00 : f32
      %184 = vector.broadcast %cst_123 : f32 to vector<1x4x8x128xf32>
      %c0_124 = arith.constant 0 : index
      %c0_125 = arith.constant 0 : index
      %c0_126 = arith.constant 0 : index
      %c0_127 = arith.constant 0 : index
      %185 = vector.load %arg4[%c0_124, %c0_125, %c0_126, %c0_127] : memref<1x4x8x128xf32, #tpu.memory_space<vmem>>, vector<1x4x8x128xf32>
      tpu.vector_store %arg4[%c0_124, %c0_125, %c0_126, %c0_127], %184 {strides = array<i32>} : memref<1x4x8x128xf32, #tpu.memory_space<vmem>>, vector<1x4x8x128xf32>,
      %cst_128 = arith.constant 0.000000e+00 : f32
      %186 = vector.broadcast %cst_128 : f32 to vector<1x4x8x128xf32>
      %c0_129 = arith.constant 0 : index
      %c0_130 = arith.constant 0 : index
      %c0_131 = arith.constant 0 : index
      %c0_132 = arith.constant 0 : index
      %187 = vector.load %arg5[%c0_129, %c0_130, %c0_131, %c0_132] : memref<1x4x8x128xf32, #tpu.memory_space<vmem>>, vector<1x4x8x128xf32>
      tpu.vector_store %arg5[%c0_129, %c0_130, %c0_131, %c0_132], %186 {strides = array<i32>} : memref<1x4x8x128xf32, #tpu.memory_space<vmem>>, vector<1x4x8x128xf32>,
      %cst_133 = arith.constant 0.000000e+00 : f32
      %188 = vector.broadcast %cst_133 : f32 to vector<1x4x8x128xf32>
      %c0_134 = arith.constant 0 : index
      %c0_135 = arith.constant 0 : index
      %c0_136 = arith.constant 0 : index
      %c0_137 = arith.constant 0 : index
      %189 = vector.load %arg6[%c0_134, %c0_135, %c0_136, %c0_137] : memref<1x4x8x128xf32, #tpu.memory_space<vmem>>, vector<1x4x8x128xf32>
      tpu.vector_store %arg6[%c0_134, %c0_135, %c0_136, %c0_137], %188 {strides = array<i32>} : memref<1x4x8x128xf32, #tpu.memory_space<vmem>>, vector<1x4x8x128xf32>,
    } else {
    }
    %c0 = arith.constant 0 : index
    %c0_1 = arith.constant 0 : index
    %c0_2 = arith.constant 0 : index
    %c0_3 = arith.constant 0 : index
    %c0_4 = arith.constant 0 : index
    %3 = vector.load %arg2[%c0, %c0_1, %c0_2, %c0_3, %c0_4] : memref<2x4x1x8x128xf32, #tpu.memory_space<vmem>>, vector<2x4x1x8x128xf32>
    %c0_5 = arith.constant 0 : index
    %c0_6 = arith.constant 0 : index
    %c0_7 = arith.constant 0 : index
    %c0_8 = arith.constant 0 : index
    %c0_9 = arith.constant 0 : index
    %4 = vector.load %arg3[%c0_5, %c0_6, %c0_7, %c0_8, %c0_9] : memref<2x1x1x8x128xi32, #tpu.memory_space<vmem>>, vector<2x1x1x8x128xi32>
    %5 = vector.shape_cast %4 : vector<2x1x1x8x128xi32> to vector<2x1x8x128xi32>
    %6 = tpu.iota {dimensions = array<i32: 0>} : vector<1x8x128xi32>
    %7 = tpu.iota {dimensions = array<i32: 1>} : vector<1x8x128xi32>
    %8 = tpu.iota {dimensions = array<i32: 2>} : vector<1x8x128xi32>
    %c1_i32 = arith.constant 1 : i32
    %9 = arith.muli %arg1, %c1_i32 : i32
    %10 = vector.broadcast %9 : i32 to vector<1x8x128xi32>
    %11 = arith.addi %10, %6 : vector<1x8x128xi32>
    %c8_i32 = arith.constant 8 : i32
    %12 = vector.broadcast %c8_i32 : i32 to vector<1x8x128xi32>
    %13 = arith.muli %11, %12 : vector<1x8x128xi32>
    %14 = arith.addi %13, %7 : vector<1x8x128xi32>
    %c128_i32 = arith.constant 128 : i32
    %15 = vector.broadcast %c128_i32 : i32 to vector<1x8x128xi32>
    %16 = arith.muli %14, %15 : vector<1x8x128xi32>
    %17 = arith.addi %16, %8 : vector<1x8x128xi32>
    %c256_i32 = arith.constant 256 : i32
    %18 = vector.broadcast %c256_i32 : i32 to vector<1x8x128xi32>
    %19 = arith.cmpi slt, %17, %18 : vector<1x8x128xi32>
    %20 = vector.shape_cast %19 : vector<1x8x128xi1> to vector<1x1x1x8x128xi1>
    %cst = arith.constant 0.000000e+00 : f32
    %21 = vector.shape_cast %20 : vector<1x1x1x8x128xi1> to vector<1x1x1x8x128xi1>
    %22 = vector.broadcast %21 : vector<1x1x1x8x128xi1> to vector<2x4x1x8x128xi1>
    %23 = vector.broadcast %cst : f32 to vector<2x4x1x8x128xf32>
    %24 = arith.select %22, %3, %23 : vector<2x4x1x8x128xi1>, vector<2x4x1x8x128xf32>
    %cst_10 = arith.constant dense<0xFF800000> : vector<2x1x8x128xf32>
    %25 = vector.multi_reduction <maximumf>, %24, %cst_10 [1] : vector<2x4x1x8x128xf32> to vector<2x1x8x128xf32>
    %26 = vector.shape_cast %25 : vector<2x1x8x128xf32> to vector<2x1x1x8x128xf32>
    %27 = vector.broadcast %26 : vector<2x1x1x8x128xf32> to vector<2x4x1x8x128xf32>
    %28 = arith.subf %24, %27 : vector<2x4x1x8x128xf32>
    %29 = math.exp %28 : vector<2x4x1x8x128xf32>
    %cst_11 = arith.constant dense<0.000000e+00> : vector<2x1x8x128xf32>
    %30 = vector.multi_reduction <add>, %29, %cst_11 [1] : vector<2x4x1x8x128xf32> to vector<2x1x8x128xf32>
    %31 = tpu.reciprocal %30 : vector<2x1x8x128xf32> -> vector<2x1x8x128xf32>
    %32 = vector.extract_strided_slice %29 {offsets = [0, 0, 0, 0, 0], sizes = [2, 1, 1, 8, 128], strides = [1, 1, 1, 1, 1]} : vector<2x4x1x8x128xf32> to vector<2x1x1x8x128xf32>
    %33 = vector.shape_cast %32 : vector<2x1x1x8x128xf32> to vector<2x1x8x128xf32>
    %34 = arith.mulf %33, %31 : vector<2x1x8x128xf32>
    %c0_i32_12 = arith.constant 0 : i32
    %35 = vector.broadcast %c0_i32_12 : i32 to vector<2x1x8x128xi32>
    %36 = arith.cmpi eq, %5, %35 : vector<2x1x8x128xi32>
    %37 = arith.mulf %34, %34 : vector<2x1x8x128xf32>
    %38 = vector.shape_cast %19 : vector<1x8x128xi1> to vector<1x1x8x128xi1>
    %39 = vector.broadcast %38 : vector<1x1x8x128xi1> to vector<2x1x8x128xi1>
    %40 = arith.andi %36, %39 : vector<2x1x8x128xi1>
    %41 = vector.shape_cast %19 : vector<1x8x128xi1> to vector<1x1x8x128xi1>
    %cst_13 = arith.constant 0.000000e+00 : f32
    %42 = vector.shape_cast %41 : vector<1x1x8x128xi1> to vector<1x1x8x128xi1>
    %43 = vector.broadcast %42 : vector<1x1x8x128xi1> to vector<2x1x8x128xi1>
    %44 = vector.broadcast %cst_13 : f32 to vector<2x1x8x128xf32>
    %45 = arith.select %43, %37, %44 : vector<2x1x8x128xi1>, vector<2x1x8x128xf32>
    %46 = arith.extui %40 : vector<2x1x8x128xi1> to vector<2x1x8x128xi32>
    %47 = arith.sitofp %46 : vector<2x1x8x128xi32> to vector<2x1x8x128xf32>
    %c0_14 = arith.constant 0 : index
    %c0_15 = arith.constant 0 : index
    %c0_16 = arith.constant 0 : index
    %c0_17 = arith.constant 0 : index
    %48 = vector.load %arg4[%c0_14, %c0_15, %c0_16, %c0_17] : memref<1x4x8x128xf32, #tpu.memory_space<vmem>>, vector<1x1x8x128xf32>
    %49 = vector.shape_cast %48 : vector<1x1x8x128xf32> to vector<8x128xf32>
    %50 = arith.mulf %34, %47 : vector<2x1x8x128xf32>
    %cst_18 = arith.constant dense<0.000000e+00> : vector<8x128xf32>
    %51 = vector.multi_reduction <add>, %50, %cst_18 [0, 1] : vector<2x1x8x128xf32> to vector<8x128xf32>
    %52 = arith.addf %49, %51 : vector<8x128xf32>
    %c0_19 = arith.constant 0 : index
    %c0_20 = arith.constant 0 : index
    %c0_21 = arith.constant 0 : index
    %c0_22 = arith.constant 0 : index
    %53 = vector.load %arg4[%c0_19, %c0_20, %c0_21, %c0_22] : memref<1x4x8x128xf32, #tpu.memory_space<vmem>>, vector<1x1x8x128xf32>
    %54 = vector.shape_cast %53 : vector<1x1x8x128xf32> to vector<8x128xf32>
    %55 = vector.shape_cast %52 : vector<8x128xf32> to vector<1x1x8x128xf32>
    tpu.vector_store %arg4[%c0_19, %c0_20, %c0_21, %c0_22], %55 {strides = array<i32>} : memref<1x4x8x128xf32, #tpu.memory_space<vmem>>, vector<1x1x8x128xf32>,
    %c0_23 = arith.constant 0 : index
    %c0_24 = arith.constant 0 : index
    %c0_25 = arith.constant 0 : index
    %c0_26 = arith.constant 0 : index
    %56 = vector.load %arg5[%c0_23, %c0_24, %c0_25, %c0_26] : memref<1x4x8x128xf32, #tpu.memory_space<vmem>>, vector<1x1x8x128xf32>
    %57 = vector.shape_cast %56 : vector<1x1x8x128xf32> to vector<8x128xf32>
    %cst_27 = arith.constant dense<0.000000e+00> : vector<8x128xf32>
    %58 = vector.multi_reduction <add>, %47, %cst_27 [0, 1] : vector<2x1x8x128xf32> to vector<8x128xf32>
    %59 = arith.addf %57, %58 : vector<8x128xf32>
    %c0_28 = arith.constant 0 : index
    %c0_29 = arith.constant 0 : index
    %c0_30 = arith.constant 0 : index
    %c0_31 = arith.constant 0 : index
    %60 = vector.load %arg5[%c0_28, %c0_29, %c0_30, %c0_31] : memref<1x4x8x128xf32, #tpu.memory_space<vmem>>, vector<1x1x8x128xf32>
    %61 = vector.shape_cast %60 : vector<1x1x8x128xf32> to vector<8x128xf32>
    %62 = vector.shape_cast %59 : vector<8x128xf32> to vector<1x1x8x128xf32>
    tpu.vector_store %arg5[%c0_28, %c0_29, %c0_30, %c0_31], %62 {strides = array<i32>} : memref<1x4x8x128xf32, #tpu.memory_space<vmem>>, vector<1x1x8x128xf32>,
    %c0_32 = arith.constant 0 : index
    %c0_33 = arith.constant 0 : index
    %c0_34 = arith.constant 0 : index
    %c0_35 = arith.constant 0 : index
    %63 = vector.load %arg6[%c0_32, %c0_33, %c0_34, %c0_35] : memref<1x4x8x128xf32, #tpu.memory_space<vmem>>, vector<1x1x8x128xf32>
    %64 = vector.shape_cast %63 : vector<1x1x8x128xf32> to vector<8x128xf32>
    %cst_36 = arith.constant dense<0.000000e+00> : vector<8x128xf32>
    %65 = vector.multi_reduction <add>, %45, %cst_36 [0, 1] : vector<2x1x8x128xf32> to vector<8x128xf32>
    %66 = arith.addf %64, %65 : vector<8x128xf32>
    %c0_37 = arith.constant 0 : index
    %c0_38 = arith.constant 0 : index
    %c0_39 = arith.constant 0 : index
    %c0_40 = arith.constant 0 : index
    %67 = vector.load %arg6[%c0_37, %c0_38, %c0_39, %c0_40] : memref<1x4x8x128xf32, #tpu.memory_space<vmem>>, vector<1x1x8x128xf32>
    %68 = vector.shape_cast %67 : vector<1x1x8x128xf32> to vector<8x128xf32>
    %69 = vector.shape_cast %66 : vector<8x128xf32> to vector<1x1x8x128xf32>
    tpu.vector_store %arg6[%c0_37, %c0_38, %c0_39, %c0_40], %69 {strides = array<i32>} : memref<1x4x8x128xf32, #tpu.memory_space<vmem>>, vector<1x1x8x128xf32>,
    %70 = vector.extract_strided_slice %29 {offsets = [0, 1, 0, 0, 0], sizes = [2, 1, 1, 8, 128], strides = [1, 1, 1, 1, 1]} : vector<2x4x1x8x128xf32> to vector<2x1x1x8x128xf32>
    %71 = vector.shape_cast %70 : vector<2x1x1x8x128xf32> to vector<2x1x8x128xf32>
    %72 = arith.mulf %71, %31 : vector<2x1x8x128xf32>
    %c1_i32_41 = arith.constant 1 : i32
    %73 = vector.broadcast %c1_i32_41 : i32 to vector<2x1x8x128xi32>
    %74 = arith.cmpi eq, %5, %73 : vector<2x1x8x128xi32>
    %75 = arith.mulf %72, %72 : vector<2x1x8x128xf32>
    %76 = vector.shape_cast %19 : vector<1x8x128xi1> to vector<1x1x8x128xi1>
    %77 = vector.broadcast %76 : vector<1x1x8x128xi1> to vector<2x1x8x128xi1>
    %78 = arith.andi %74, %77 : vector<2x1x8x128xi1>
    %79 = vector.shape_cast %19 : vector<1x8x128xi1> to vector<1x1x8x128xi1>
    %cst_42 = arith.constant 0.000000e+00 : f32
    %80 = vector.shape_cast %79 : vector<1x1x8x128xi1> to vector<1x1x8x128xi1>
    %81 = vector.broadcast %80 : vector<1x1x8x128xi1> to vector<2x1x8x128xi1>
    %82 = vector.broadcast %cst_42 : f32 to vector<2x1x8x128xf32>
    %83 = arith.select %81, %75, %82 : vector<2x1x8x128xi1>, vector<2x1x8x128xf32>
    %84 = arith.extui %78 : vector<2x1x8x128xi1> to vector<2x1x8x128xi32>
    %85 = arith.sitofp %84 : vector<2x1x8x128xi32> to vector<2x1x8x128xf32>
    %c0_43 = arith.constant 0 : index
    %c1 = arith.constant 1 : index
    %c0_44 = arith.constant 0 : index
    %c0_45 = arith.constant 0 : index
    %86 = vector.load %arg4[%c0_43, %c1, %c0_44, %c0_45] : memref<1x4x8x128xf32, #tpu.memory_space<vmem>>, vector<1x1x8x128xf32>
    %87 = vector.shape_cast %86 : vector<1x1x8x128xf32> to vector<8x128xf32>
    %88 = arith.mulf %72, %85 : vector<2x1x8x128xf32>
    %cst_46 = arith.constant dense<0.000000e+00> : vector<8x128xf32>
    %89 = vector.multi_reduction <add>, %88, %cst_46 [0, 1] : vector<2x1x8x128xf32> to vector<8x128xf32>
    %90 = arith.addf %87, %89 : vector<8x128xf32>
    %c0_47 = arith.constant 0 : index
    %c1_48 = arith.constant 1 : index
    %c0_49 = arith.constant 0 : index
    %c0_50 = arith.constant 0 : index
    %91 = vector.load %arg4[%c0_47, %c1_48, %c0_49, %c0_50] : memref<1x4x8x128xf32, #tpu.memory_space<vmem>>, vector<1x1x8x128xf32>
    %92 = vector.shape_cast %91 : vector<1x1x8x128xf32> to vector<8x128xf32>
    %93 = vector.shape_cast %90 : vector<8x128xf32> to vector<1x1x8x128xf32>
    tpu.vector_store %arg4[%c0_47, %c1_48, %c0_49, %c0_50], %93 {strides = array<i32>} : memref<1x4x8x128xf32, #tpu.memory_space<vmem>>, vector<1x1x8x128xf32>,
    %c0_51 = arith.constant 0 : index
    %c1_52 = arith.constant 1 : index
    %c0_53 = arith.constant 0 : index
    %c0_54 = arith.constant 0 : index
    %94 = vector.load %arg5[%c0_51, %c1_52, %c0_53, %c0_54] : memref<1x4x8x128xf32, #tpu.memory_space<vmem>>, vector<1x1x8x128xf32>
    %95 = vector.shape_cast %94 : vector<1x1x8x128xf32> to vector<8x128xf32>
    %cst_55 = arith.constant dense<0.000000e+00> : vector<8x128xf32>
    %96 = vector.multi_reduction <add>, %85, %cst_55 [0, 1] : vector<2x1x8x128xf32> to vector<8x128xf32>
    %97 = arith.addf %95, %96 : vector<8x128xf32>
    %c0_56 = arith.constant 0 : index
    %c1_57 = arith.constant 1 : index
    %c0_58 = arith.constant 0 : index
    %c0_59 = arith.constant 0 : index
    %98 = vector.load %arg5[%c0_56, %c1_57, %c0_58, %c0_59] : memref<1x4x8x128xf32, #tpu.memory_space<vmem>>, vector<1x1x8x128xf32>
    %99 = vector.shape_cast %98 : vector<1x1x8x128xf32> to vector<8x128xf32>
    %100 = vector.shape_cast %97 : vector<8x128xf32> to vector<1x1x8x128xf32>
    tpu.vector_store %arg5[%c0_56, %c1_57, %c0_58, %c0_59], %100 {strides = array<i32>} : memref<1x4x8x128xf32, #tpu.memory_space<vmem>>, vector<1x1x8x128xf32>,
    %c0_60 = arith.constant 0 : index
    %c1_61 = arith.constant 1 : index
    %c0_62 = arith.constant 0 : index
    %c0_63 = arith.constant 0 : index
    %101 = vector.load %arg6[%c0_60, %c1_61, %c0_62, %c0_63] : memref<1x4x8x128xf32, #tpu.memory_space<vmem>>, vector<1x1x8x128xf32>
    %102 = vector.shape_cast %101 : vector<1x1x8x128xf32> to vector<8x128xf32>
    %cst_64 = arith.constant dense<0.000000e+00> : vector<8x128xf32>
    %103 = vector.multi_reduction <add>, %83, %cst_64 [0, 1] : vector<2x1x8x128xf32> to vector<8x128xf32>
    %104 = arith.addf %102, %103 : vector<8x128xf32>
    %c0_65 = arith.constant 0 : index
    %c1_66 = arith.constant 1 : index
    %c0_67 = arith.constant 0 : index
    %c0_68 = arith.constant 0 : index
    %105 = vector.load %arg6[%c0_65, %c1_66, %c0_67, %c0_68] : memref<1x4x8x128xf32, #tpu.memory_space<vmem>>, vector<1x1x8x128xf32>
    %106 = vector.shape_cast %105 : vector<1x1x8x128xf32> to vector<8x128xf32>
    %107 = vector.shape_cast %104 : vector<8x128xf32> to vector<1x1x8x128xf32>
    tpu.vector_store %arg6[%c0_65, %c1_66, %c0_67, %c0_68], %107 {strides = array<i32>} : memref<1x4x8x128xf32, #tpu.memory_space<vmem>>, vector<1x1x8x128xf32>,
    %108 = vector.extract_strided_slice %29 {offsets = [0, 2, 0, 0, 0], sizes = [2, 1, 1, 8, 128], strides = [1, 1, 1, 1, 1]} : vector<2x4x1x8x128xf32> to vector<2x1x1x8x128xf32>
    %109 = vector.shape_cast %108 : vector<2x1x1x8x128xf32> to vector<2x1x8x128xf32>
    %110 = arith.mulf %109, %31 : vector<2x1x8x128xf32>
    %c2_i32 = arith.constant 2 : i32
    %111 = vector.broadcast %c2_i32 : i32 to vector<2x1x8x128xi32>
    %112 = arith.cmpi eq, %5, %111 : vector<2x1x8x128xi32>
    %113 = arith.mulf %110, %110 : vector<2x1x8x128xf32>
    %114 = vector.shape_cast %19 : vector<1x8x128xi1> to vector<1x1x8x128xi1>
    %115 = vector.broadcast %114 : vector<1x1x8x128xi1> to vector<2x1x8x128xi1>
    %116 = arith.andi %112, %115 : vector<2x1x8x128xi1>
    %117 = vector.shape_cast %19 : vector<1x8x128xi1> to vector<1x1x8x128xi1>
    %cst_69 = arith.constant 0.000000e+00 : f32
    %118 = vector.shape_cast %117 : vector<1x1x8x128xi1> to vector<1x1x8x128xi1>
    %119 = vector.broadcast %118 : vector<1x1x8x128xi1> to vector<2x1x8x128xi1>
    %120 = vector.broadcast %cst_69 : f32 to vector<2x1x8x128xf32>
    %121 = arith.select %119, %113, %120 : vector<2x1x8x128xi1>, vector<2x1x8x128xf32>
    %122 = arith.extui %116 : vector<2x1x8x128xi1> to vector<2x1x8x128xi32>
    %123 = arith.sitofp %122 : vector<2x1x8x128xi32> to vector<2x1x8x128xf32>
    %c0_70 = arith.constant 0 : index
    %c2 = arith.constant 2 : index
    %c0_71 = arith.constant 0 : index
    %c0_72 = arith.constant 0 : index
    %124 = vector.load %arg4[%c0_70, %c2, %c0_71, %c0_72] : memref<1x4x8x128xf32, #tpu.memory_space<vmem>>, vector<1x1x8x128xf32>
    %125 = vector.shape_cast %124 : vector<1x1x8x128xf32> to vector<8x128xf32>
    %126 = arith.mulf %110, %123 : vector<2x1x8x128xf32>
    %cst_73 = arith.constant dense<0.000000e+00> : vector<8x128xf32>
    %127 = vector.multi_reduction <add>, %126, %cst_73 [0, 1] : vector<2x1x8x128xf32> to vector<8x128xf32>
    %128 = arith.addf %125, %127 : vector<8x128xf32>
    %c0_74 = arith.constant 0 : index
    %c2_75 = arith.constant 2 : index
    %c0_76 = arith.constant 0 : index
    %c0_77 = arith.constant 0 : index
    %129 = vector.load %arg4[%c0_74, %c2_75, %c0_76, %c0_77] : memref<1x4x8x128xf32, #tpu.memory_space<vmem>>, vector<1x1x8x128xf32>
    %130 = vector.shape_cast %129 : vector<1x1x8x128xf32> to vector<8x128xf32>
    %131 = vector.shape_cast %128 : vector<8x128xf32> to vector<1x1x8x128xf32>
    tpu.vector_store %arg4[%c0_74, %c2_75, %c0_76, %c0_77], %131 {strides = array<i32>} : memref<1x4x8x128xf32, #tpu.memory_space<vmem>>, vector<1x1x8x128xf32>,
    %c0_78 = arith.constant 0 : index
    %c2_79 = arith.constant 2 : index
    %c0_80 = arith.constant 0 : index
    %c0_81 = arith.constant 0 : index
    %132 = vector.load %arg5[%c0_78, %c2_79, %c0_80, %c0_81] : memref<1x4x8x128xf32, #tpu.memory_space<vmem>>, vector<1x1x8x128xf32>
    %133 = vector.shape_cast %132 : vector<1x1x8x128xf32> to vector<8x128xf32>
    %cst_82 = arith.constant dense<0.000000e+00> : vector<8x128xf32>
    %134 = vector.multi_reduction <add>, %123, %cst_82 [0, 1] : vector<2x1x8x128xf32> to vector<8x128xf32>
    %135 = arith.addf %133, %134 : vector<8x128xf32>
    %c0_83 = arith.constant 0 : index
    %c2_84 = arith.constant 2 : index
    %c0_85 = arith.constant 0 : index
    %c0_86 = arith.constant 0 : index
    %136 = vector.load %arg5[%c0_83, %c2_84, %c0_85, %c0_86] : memref<1x4x8x128xf32, #tpu.memory_space<vmem>>, vector<1x1x8x128xf32>
    %137 = vector.shape_cast %136 : vector<1x1x8x128xf32> to vector<8x128xf32>
    %138 = vector.shape_cast %135 : vector<8x128xf32> to vector<1x1x8x128xf32>
    tpu.vector_store %arg5[%c0_83, %c2_84, %c0_85, %c0_86], %138 {strides = array<i32>} : memref<1x4x8x128xf32, #tpu.memory_space<vmem>>, vector<1x1x8x128xf32>,
    %c0_87 = arith.constant 0 : index
    %c2_88 = arith.constant 2 : index
    %c0_89 = arith.constant 0 : index
    %c0_90 = arith.constant 0 : index
    %139 = vector.load %arg6[%c0_87, %c2_88, %c0_89, %c0_90] : memref<1x4x8x128xf32, #tpu.memory_space<vmem>>, vector<1x1x8x128xf32>
    %140 = vector.shape_cast %139 : vector<1x1x8x128xf32> to vector<8x128xf32>
    %cst_91 = arith.constant dense<0.000000e+00> : vector<8x128xf32>
    %141 = vector.multi_reduction <add>, %121, %cst_91 [0, 1] : vector<2x1x8x128xf32> to vector<8x128xf32>
    %142 = arith.addf %140, %141 : vector<8x128xf32>
    %c0_92 = arith.constant 0 : index
    %c2_93 = arith.constant 2 : index
    %c0_94 = arith.constant 0 : index
    %c0_95 = arith.constant 0 : index
    %143 = vector.load %arg6[%c0_92, %c2_93, %c0_94, %c0_95] : memref<1x4x8x128xf32, #tpu.memory_space<vmem>>, vector<1x1x8x128xf32>
    %144 = vector.shape_cast %143 : vector<1x1x8x128xf32> to vector<8x128xf32>
    %145 = vector.shape_cast %142 : vector<8x128xf32> to vector<1x1x8x128xf32>
    tpu.vector_store %arg6[%c0_92, %c2_93, %c0_94, %c0_95], %145 {strides = array<i32>} : memref<1x4x8x128xf32, #tpu.memory_space<vmem>>, vector<1x1x8x128xf32>,
    %146 = vector.extract_strided_slice %29 {offsets = [0, 3, 0, 0, 0], sizes = [2, 1, 1, 8, 128], strides = [1, 1, 1, 1, 1]} : vector<2x4x1x8x128xf32> to vector<2x1x1x8x128xf32>
    %147 = vector.shape_cast %146 : vector<2x1x1x8x128xf32> to vector<2x1x8x128xf32>
    %148 = arith.mulf %147, %31 : vector<2x1x8x128xf32>
    %c3_i32 = arith.constant 3 : i32
    %149 = vector.broadcast %c3_i32 : i32 to vector<2x1x8x128xi32>
    %150 = arith.cmpi eq, %5, %149 : vector<2x1x8x128xi32>
    %151 = arith.mulf %148, %148 : vector<2x1x8x128xf32>
    %152 = vector.shape_cast %19 : vector<1x8x128xi1> to vector<1x1x8x128xi1>
    %153 = vector.broadcast %152 : vector<1x1x8x128xi1> to vector<2x1x8x128xi1>
    %154 = arith.andi %150, %153 : vector<2x1x8x128xi1>
    %155 = vector.shape_cast %19 : vector<1x8x128xi1> to vector<1x1x8x128xi1>
    %cst_96 = arith.constant 0.000000e+00 : f32
    %156 = vector.shape_cast %155 : vector<1x1x8x128xi1> to vector<1x1x8x128xi1>
    %157 = vector.broadcast %156 : vector<1x1x8x128xi1> to vector<2x1x8x128xi1>
    %158 = vector.broadcast %cst_96 : f32 to vector<2x1x8x128xf32>
    %159 = arith.select %157, %151, %158 : vector<2x1x8x128xi1>, vector<2x1x8x128xf32>
    %160 = arith.extui %154 : vector<2x1x8x128xi1> to vector<2x1x8x128xi32>
    %161 = arith.sitofp %160 : vector<2x1x8x128xi32> to vector<2x1x8x128xf32>
    %c0_97 = arith.constant 0 : index
    %c3 = arith.constant 3 : index
    %c0_98 = arith.constant 0 : index
    %c0_99 = arith.constant 0 : index
    %162 = vector.load %arg4[%c0_97, %c3, %c0_98, %c0_99] : memref<1x4x8x128xf32, #tpu.memory_space<vmem>>, vector<1x1x8x128xf32>
    %163 = vector.shape_cast %162 : vector<1x1x8x128xf32> to vector<8x128xf32>
    %164 = arith.mulf %148, %161 : vector<2x1x8x128xf32>
    %cst_100 = arith.constant dense<0.000000e+00> : vector<8x128xf32>
    %165 = vector.multi_reduction <add>, %164, %cst_100 [0, 1] : vector<2x1x8x128xf32> to vector<8x128xf32>
    %166 = arith.addf %163, %165 : vector<8x128xf32>
    %c0_101 = arith.constant 0 : index
    %c3_102 = arith.constant 3 : index
    %c0_103 = arith.constant 0 : index
    %c0_104 = arith.constant 0 : index
    %167 = vector.load %arg4[%c0_101, %c3_102, %c0_103, %c0_104] : memref<1x4x8x128xf32, #tpu.memory_space<vmem>>, vector<1x1x8x128xf32>
    %168 = vector.shape_cast %167 : vector<1x1x8x128xf32> to vector<8x128xf32>
    %169 = vector.shape_cast %166 : vector<8x128xf32> to vector<1x1x8x128xf32>
    tpu.vector_store %arg4[%c0_101, %c3_102, %c0_103, %c0_104], %169 {strides = array<i32>} : memref<1x4x8x128xf32, #tpu.memory_space<vmem>>, vector<1x1x8x128xf32>,
    %c0_105 = arith.constant 0 : index
    %c3_106 = arith.constant 3 : index
    %c0_107 = arith.constant 0 : index
    %c0_108 = arith.constant 0 : index
    %170 = vector.load %arg5[%c0_105, %c3_106, %c0_107, %c0_108] : memref<1x4x8x128xf32, #tpu.memory_space<vmem>>, vector<1x1x8x128xf32>
    %171 = vector.shape_cast %170 : vector<1x1x8x128xf32> to vector<8x128xf32>
    %cst_109 = arith.constant dense<0.000000e+00> : vector<8x128xf32>
    %172 = vector.multi_reduction <add>, %161, %cst_109 [0, 1] : vector<2x1x8x128xf32> to vector<8x128xf32>
    %173 = arith.addf %171, %172 : vector<8x128xf32>
    %c0_110 = arith.constant 0 : index
    %c3_111 = arith.constant 3 : index
    %c0_112 = arith.constant 0 : index
    %c0_113 = arith.constant 0 : index
    %174 = vector.load %arg5[%c0_110, %c3_111, %c0_112, %c0_113] : memref<1x4x8x128xf32, #tpu.memory_space<vmem>>, vector<1x1x8x128xf32>
    %175 = vector.shape_cast %174 : vector<1x1x8x128xf32> to vector<8x128xf32>
    %176 = vector.shape_cast %173 : vector<8x128xf32> to vector<1x1x8x128xf32>
    tpu.vector_store %arg5[%c0_110, %c3_111, %c0_112, %c0_113], %176 {strides = array<i32>} : memref<1x4x8x128xf32, #tpu.memory_space<vmem>>, vector<1x1x8x128xf32>,
    %c0_114 = arith.constant 0 : index
    %c3_115 = arith.constant 3 : index
    %c0_116 = arith.constant 0 : index
    %c0_117 = arith.constant 0 : index
    %177 = vector.load %arg6[%c0_114, %c3_115, %c0_116, %c0_117] : memref<1x4x8x128xf32, #tpu.memory_space<vmem>>, vector<1x1x8x128xf32>
    %178 = vector.shape_cast %177 : vector<1x1x8x128xf32> to vector<8x128xf32>
    %cst_118 = arith.constant dense<0.000000e+00> : vector<8x128xf32>
    %179 = vector.multi_reduction <add>, %159, %cst_118 [0, 1] : vector<2x1x8x128xf32> to vector<8x128xf32>
    %180 = arith.addf %178, %179 : vector<8x128xf32>
    %c0_119 = arith.constant 0 : index
    %c3_120 = arith.constant 3 : index
    %c0_121 = arith.constant 0 : index
    %c0_122 = arith.constant 0 : index
    %181 = vector.load %arg6[%c0_119, %c3_120, %c0_121, %c0_122] : memref<1x4x8x128xf32, #tpu.memory_space<vmem>>, vector<1x1x8x128xf32>
    %182 = vector.shape_cast %181 : vector<1x1x8x128xf32> to vector<8x128xf32>
    %183 = vector.shape_cast %180 : vector<8x128xf32> to vector<1x1x8x128xf32>
    tpu.vector_store %arg6[%c0_119, %c3_120, %c0_121, %c0_122], %183 {strides = array<i32>} : memref<1x4x8x128xf32, #tpu.memory_space<vmem>>, vector<1x1x8x128xf32>,
    return
  }
  func.func @transform_0(%arg0: i32, %arg1: i32) -> (i32, i32, i32, i32, i32) {
    %c0_i32 = arith.constant 0 : i32
    %c0_i32_0 = arith.constant 0 : i32
    %c0_i32_1 = arith.constant 0 : i32
    %c0_i32_2 = arith.constant 0 : i32
    return %arg0, %c0_i32, %arg1, %c0_i32_0, %c0_i32_1 : i32, i32, i32, i32, i32
  }
  func.func @transform_1(%arg0: i32, %arg1: i32) -> (i32, i32, i32, i32, i32) {
    %c0_i32 = arith.constant 0 : i32
    %c0_i32_0 = arith.constant 0 : i32
    %c0_i32_1 = arith.constant 0 : i32
    %c0_i32_2 = arith.constant 0 : i32
    return %arg0, %c0_i32, %arg1, %c0_i32_0, %c0_i32_1 : i32, i32, i32, i32, i32
  }
  func.func @transform_2(%arg0: i32, %arg1: i32) -> (i32, i32, i32, i32) {
    %c0_i32 = arith.constant 0 : i32
    %c0_i32_0 = arith.constant 0 : i32
    %c0_i32_1 = arith.constant 0 : i32
    %c0_i32_2 = arith.constant 0 : i32
    return %arg0, %c0_i32, %c0_i32_0, %c0_i32_1 : i32, i32, i32, i32
  }
  func.func @transform_3(%arg0: i32, %arg1: i32) -> (i32, i32, i32, i32) {
    %c0_i32 = arith.constant 0 : i32
    %c0_i32_0 = arith.constant 0 : i32
    %c0_i32_1 = arith.constant 0 : i32
    %c0_i32_2 = arith.constant 0 : i32
    return %arg0, %c0_i32, %c0_i32_0, %c0_i32_1 : i32, i32, i32, i32
  }
  func.func @transform_4(%arg0: i32, %arg1: i32) -> (i32, i32, i32, i32) {
    %c0_i32 = arith.constant 0 : i32
    %c0_i32_0 = arith.constant 0 : i32
    %c0_i32_1 = arith.constant 0 : i32
    %c0_i32_2 = arith.constant 0 : i32
    return %arg0, %c0_i32, %c0_i32_0, %c0_i32_1 : i32, i32, i32, i32
  }
}

</mosaic_0001>

<bundles_post_ra>
// kernel: tpu_custom_call.1
= control target key start
LH: loop header
LB: loop body
LE: loop exit
PB: predicated region body
PF: predicated region fallthrough
CT: control target
= control target key end

     0   :  { %10 = vsyncpa [#allocation3], 0  ;;  %s656_s0 = inlined_call_operand.hbm [shape: f32[2,4,1,8,128], index: 0, kind: input, shape index: {}]   ;;  %s657_s1 = inlined_call_operand.hbm [shape: s32[2,1,1,8,128], index: 1, kind: input, shape index: {}]   ;;  %s658_s2 = inlined_call_operand.hbm [shape: f32[1,4,8,128], index: 2, kind: output, shape index: {0}]   ;;  %s659_s3 = inlined_call_operand.hbm [shape: f32[1,4,8,128], index: 3, kind: output, shape index: {1}]   ;;  %s660_s4 = inlined_call_operand.hbm [shape: f32[1,4,8,128], index: 4, kind: output, shape index: {2}]  }
   0x1   :  { %11 = vsyncpa [#allocation6], 0 }
   0x2   :  { %12 = vsyncpa [#allocation4], 0 }
   0x3   :  { %13 = vsyncpa [#allocation9], 0  ;;  %s452_s15 = smov [#allocation2]   ;;  %s334_s19 = scalar_lea.hbm %s656_s0, 1024 }
   0x4   :  { %s19_s16 = sshll.u32 %s452_s15, 4  ;;  %p335_p0 = scmp.ne.s32.totalorder %s656_s0, %s334_s19  ;;  %s20_s16 = int_to_ptr.vmem [resolvable:$true] %s19_s16 }
   0x5   :  { %p338_p1 = scmp.lt.u32.totalorder %s334_s19, %s656_s0 }
   0x7   :  { %p340_p2 = pnand %p338_p1, %p335_p0 }
   0x9   :  { %343 = shalt.err (!%p340_p2)
}
   0xa   :  { %s344_s24 = scalar_lea.vmem %s20_s16, 1024  ;;  %p349_p4 = scmp.lt.s32.totalorder %s20_s16, %s20_s16 }
   0xb   :  { %p345_p3 = scmp.ne.s32.totalorder %s20_s16, %s344_s24  ;;  %p350_p5 = scmp.lt.s32.totalorder %s344_s24, %s344_s24 }
   0xd   :  { %p351_p6 = por %p350_p5, %p349_p4 }
   0xf   :  { %p352_p7 = pnand %p351_p6, %p345_p3 }
  0x11   :  { %355 = shalt.err (!%p352_p7)
}
  0x12   :  { %s453_s25 = smov 128   ;;  %s454_s26 = smov 8  }
  0x13   :  { %25 = dma.hbm_to_vmem [thread:$0]  %s656_s0, 1024, %s20_s16, [#allocation3], %s453_s25, %s453_s25, %s454_s26  }
  0x14   :  { %s455_s29 = smov [#allocation5]   ;;  %s356_s7 = scalar_lea.hbm %s657_s1, 256 }
  0x15   :  { %s31_s30 = sshll.u32 %s455_s29, 4  ;;  %p357_p8 = scmp.ne.s32.totalorder %s657_s1, %s356_s7  ;;  %s32_s30 = int_to_ptr.vmem [resolvable:$true] %s31_s30 }
  0x16   :  { %p360_p9 = scmp.lt.u32.totalorder %s356_s7, %s657_s1 }
  0x18   :  { %p362_p10 = pnand %p360_p9, %p357_p8 }
  0x1a   :  { %365 = shalt.err (!%p362_p10)
}
  0x1b   :  { %s366_s12 = scalar_lea.vmem %s32_s30, 256  ;;  %p371_p12 = scmp.lt.s32.totalorder %s32_s30, %s32_s30 }
  0x1c   :  { %p367_p11 = scmp.ne.s32.totalorder %s32_s30, %s366_s12  ;;  %p372_p13 = scmp.lt.s32.totalorder %s366_s12, %s366_s12 }
  0x1e   :  { %p373_p0 = por %p372_p13, %p371_p12 }
  0x20   :  { %p374_p1 = pnand %p373_p0, %p367_p11 }
  0x22   :  { %377 = shalt.err (!%p374_p1)
}
  0x23   :  { %37 = dma.hbm_to_vmem [thread:$0]  %s657_s1, 256, %s32_s30, [#allocation6], %s453_s25, %s453_s25, %s454_s26  }
  0x24   :  { %444 = dma.done.wait [#allocation3], 1024  }
  0x25   :  { %445 = vsyncadd [#allocation3], 4294966272 }
  0x26   :  { %446 = dma.done.wait [#allocation6], 256  }
  0x27   :  { %447 = vsyncadd [#allocation6], 4294967040  ;;  %v70_v0 = vlaneseq  ;;  %v68_v5 = vld [vmem:[#allocation5] sm:$0xff]  ;;  %v69_v6 = vld [vmem:[#allocation5 + $0x8] sm:$0xff]  ;;  %v456_v12 = vmov 0.0   ;;  %s457_s1 = smov [#allocation8]  }
  0x28   :  { %v60_v7 = vld [vmem:[#allocation2] sm:$0xff]  ;;  %vm130_vm1 = vcmp.eq.s32.totalorder %v68_v5, 0  ;;  %vm131_vm2 = vcmp.eq.s32.totalorder %v69_v6, 0  ;;  %vm158_vm3 = vcmp.eq.s32.totalorder %v68_v5, 1  ;;  %v61_v8 = vld [vmem:[#allocation2 + $0x8] sm:$0xff]  ;;  %v62_v9 = vld [vmem:[#allocation2 + $0x10] sm:$0xff] }
  0x29   :  { %v71_v1 = vshrl.u32 %v70_v0, 7  ;;  %v73_v2 = vand.u32 127, %v70_v0  ;;  %vm159_vm5 = vcmp.eq.s32.totalorder %v69_v6, 1  ;;  %vm189_vm6 = vcmp.eq.s32.totalorder %v68_v5, 2  ;;  %v63_v10 = vld [vmem:[#allocation2 + $0x18] sm:$0xff]  ;;  %v64_v11 = vld [vmem:[#allocation2 + $0x20] sm:$0xff] }
  0x2a   :  { %vm190_vm7 = vcmp.eq.s32.totalorder %v69_v6, 2  ;;  %vm220_vm8 = vcmp.eq.s32.totalorder %v68_v5, 3  ;;  %vm221_vm10 = vcmp.eq.s32.totalorder %v69_v6, 3  ;;  %v65_v14 = vld [vmem:[#allocation2 + $0x28] sm:$0xff]  ;;  %v66_v15 = vld [vmem:[#allocation2 + $0x30] sm:$0xff]  ;;  %v67_v19 = vld [vmem:[#allocation2 + $0x38] sm:$0xff] }
  0x2b   :  { %v77_v3 = vmul.u32 128, %v71_v1  ;;  %s266_s14 = sshll.u32 %s457_s1, 4  ;;  %s267_s14 = int_to_ptr.vmem [resolvable:$true] %s266_s14 }
  0x2c   :  { %s378_s15 = scalar_lea.vmem %s267_s14, 512  ;;  %p383_p3 = scmp.lt.s32.totalorder %s267_s14, %s267_s14 }
  0x2d   :  { %v515_v4 = vadd.s32 %v77_v3, %v73_v2  ;;  %p379_p2 = scmp.ne.s32.totalorder %s267_s14, %s378_s15  ;;  %p384_p4 = scmp.lt.s32.totalorder %s378_s15, %s378_s15 }
  0x2f   :  { %vm79_vm0 = vcmp.lt.s32.totalorder %v515_v4, 256  ;;  %p385_p5 = por %p384_p4, %p383_p3 }
  0x30   :  { %vm134_vm4 = vmand %vm130_vm1, %vm79_vm0  ;;  %v82_v16 = vsel %vm79_vm0, %v60_v7, 0.0  ;;  %v83_v17 = vsel %vm79_vm0, %v61_v8, 0.0  ;;  %v84_v20 = vsel %vm79_vm0, %v62_v9, 0.0  ;;  %v85_v21 = vsel %vm79_vm0, %v63_v10, 0.0 }
  0x31   :  { %vm135_vm9 = vmand %vm131_vm2, %vm79_vm0  ;;  %v522_v13 = vsel %vm134_vm4, 1.0, %v456_v12  ;;  %v86_v22 = vsel %vm79_vm0, %v64_v11, 0.0  ;;  %v87_v25 = vsel %vm79_vm0, %v65_v14, 0.0  ;;  %v88_v26 = vsel %vm79_vm0, %v66_v15, 0.0  ;;  %p386_p6 = pnand %p385_p5, %p379_p2 }
  0x32   :  { %v528_v18 = vsel %vm135_vm9, 1.0, %v456_v12  ;;  %vm162_vm11 = vmand %vm158_vm3, %vm79_vm0  ;;  %v89_v28 = vsel %vm79_vm0, %v67_v19, 0.0  ;;  %v90_v29 = vmax.f32 %v82_v16, %v84_v20  ;;  %v91_v30 = vmax.f32 %v83_v17, %v85_v21 }
  0x33   :  { %v149_v23 = vadd.f32 %v528_v18, %v522_v13  ;;  %vm163_vm12 = vmand %vm159_vm5, %vm79_vm0  ;;  %v544_v24 = vsel %vm162_vm11, 1.0, %v456_v12  ;;  %v93_v33 = vmax.f32 %v86_v22, %v88_v26  ;;  %v94_v36 = vmax.f32 %v87_v25, %v89_v28 }
  0x34   :  { %v550_v27 = vsel %vm163_vm12, 1.0, %v456_v12  ;;  %vm193_vm13 = vmand %vm189_vm6, %vm79_vm0  ;;  %v92_v35 = vmax.f32 %v90_v29, %v91_v30 }
  0x35   :  { %v179_v31 = vadd.f32 %v550_v27, %v544_v24  ;;  %vm194_vm14 = vmand %vm190_vm7, %vm79_vm0  ;;  %v562_v32 = vsel %vm193_vm13, 1.0, %v456_v12  ;;  %151 = vst [vmem:[#allocation8] sm:$0xff] %v149_v23  ;;  %v95_v40 = vmax.f32 %v93_v33, %v94_v36 }
  0x36   :  { %v564_v34 = vsel %vm194_vm14, 1.0, %v456_v12  ;;  %vm224_vm15 = vmand %vm220_vm8, %vm79_vm0  ;;  %v96_v41 = vsub.f32 %v82_v16, %v92_v35  ;;  %v97_v42 = vsub.f32 %v83_v17, %v92_v35  ;;  %v98_v44 = vsub.f32 %v84_v20, %v92_v35 }
  0x37   :  { %v210_v37 = vadd.f32 %v564_v34, %v562_v32  ;;  %vm225_vm1 = vmand %vm221_vm10, %vm79_vm0  ;;  %v574_v38 = vsel %vm224_vm15, 1.0, %v456_v12  ;;  %181 = vst [vmem:[#allocation8 + $0x8] sm:$0xff] %v179_v31  ;;  %v99_v45 = vsub.f32 %v85_v21, %v92_v35  ;;  %v100_v46 = vsub.f32 %v86_v22, %v95_v40 }
  0x38   :  { %v576_v39 = vsel %vm225_vm1, 1.0, %v456_v12  ;;  %v101_v47 = vsub.f32 %v87_v25, %v95_v40  ;;  %v102_v48 = vsub.f32 %v88_v26, %v95_v40  ;;  %v104_v49 = vmul.f32 1.442695, %v96_v41 }
  0x39   :  { %v241_v43 = vadd.f32 %v576_v39, %v574_v38  ;;  %212 = vst [vmem:[#allocation8 + $0x10] sm:$0xff] %v210_v37  ;;  %v106_v50 = vmul.f32 1.442695, %v97_v42  ;;  %v108_v51 = vmul.f32 1.442695, %v98_v44  ;;  %v103_v52 = vsub.f32 %v89_v28, %v95_v40 }
  0x3a   :  { %v110_v53 = vmul.f32 1.442695, %v99_v45  ;;  %314 = vpow2.f32 %v104_v49  ;;  %v112_v54 = vmul.f32 1.442695, %v100_v46  ;;  %v114_v55 = vmul.f32 1.442695, %v101_v47 }
  0x3b   :  { %243 = vst [vmem:[#allocation8 + $0x18] sm:$0xff] %v241_v43  ;;  %316 = vpow2.f32 %v106_v50 }
  0x3c   :  { %389 = shalt.err (!%p386_p6)
}
  0x3d   :  { %s390_s18 = scalar_lea.hbm %s659_s3, 512 }
  0x3e   :  { %p391_p7 = scmp.ne.s32.totalorder %s659_s3, %s390_s18  ;;  %p394_p8 = scmp.lt.u32.totalorder %s390_s18, %s659_s3 }
  0x40   :  { %p396_p9 = pnand %p394_p8, %p391_p7 }
  0x42   :  { %399 = shalt.err (!%p396_p9)
}
  0x43   :  { %272 = dma.vmem_to_hbm [thread:$0]  %s267_s14, 512, %s659_s3, [#allocation9], %s453_s25, %s453_s25, %s454_s26   ;;  %318 = vpow2.f32 %v108_v51  ;;  %v116_v56 = vmul.f32 1.442695, %v102_v48  ;;  %v118_v57 = vmul.f32 1.442695, %v103_v52 }
  0x44   :  { %320 = vpow2.f32 %v110_v53  ;;  %v315_v58 = vpop.eup %314  ;;  %s458_s3 = smov [#allocation7]   ;;  %s459_s28 = smov [#allocation10]  }
  0x45   :  { %322 = vpow2.f32 %v112_v54  ;;  %v317_v59 = vpop.eup %316  ;;  %s254_s27 = sshll.u32 %s458_s3, 4  ;;  %s278_s29 = sshll.u32 %s459_s28, 4  ;;  %s255_s27 = int_to_ptr.vmem [resolvable:$true] %s254_s27  ;;  %s619_s29 = int_to_ptr.vmem [resolvable:$true] %s278_s29 }
  0x46   :  { %324 = vpow2.f32 %v114_v55  ;;  %v120_v61 = vadd.f32 %v317_v59, %v315_v58  ;;  %s400_s30 = scalar_lea.vmem %s255_s27, 512  ;;  %p405_p11 = scmp.lt.s32.totalorder %s255_s27, %s255_s27 }
  0x47   :  { %326 = vpow2.f32 %v116_v56  ;;  %p401_p10 = scmp.ne.s32.totalorder %s255_s27, %s400_s30  ;;  %p406_p12 = scmp.lt.s32.totalorder %s400_s30, %s400_s30 }
  0x48   :  { %328 = vpow2.f32 %v118_v57 }
  0x49   :  { %p407_p13 = por %p406_p12, %p405_p11 }
  0x4b   :  { %p408_p0 = pnand %p407_p13, %p401_p10 }
  0x4d   :  { %v319_v60 = vpop.eup %318 }
  0x4e   :  { %v321_v62 = vpop.eup %320  ;;  %v121_v0 = vadd.f32 %v319_v60, %v120_v61 }
  0x4f   :  { %v323_v63 = vpop.eup %322 }
  0x50   :  { %v325_v1 = vpop.eup %324  ;;  %v122_v3 = vadd.f32 %v321_v62, %v121_v0 }
  0x51   :  { %v327_v2 = vpop.eup %326  ;;  %v123_v5 = vadd.f32 %v325_v1, %v323_v63 }
  0x52   :  { %v329_v6 = vpop.eup %328  ;;  %330 = vrcp.f32 %v122_v3 }
  0x53   :  { %v124_v7 = vadd.f32 %v327_v2, %v123_v5 }
  0x55   :  { %v125_v8 = vadd.f32 %v329_v6, %v124_v7 }
  0x57   :  { %332 = vrcp.f32 %v125_v8 }
  0x5c   :  { %v331_v9 = vpop.eup %330 }
  0x5d   :  { %v128_v10 = vmul.f32 %v331_v9, %v315_v58  ;;  %v156_v11 = vmul.f32 %v331_v9, %v317_v59  ;;  %v187_v12 = vmul.f32 %v331_v9, %v319_v60  ;;  %v218_v14 = vmul.f32 %v331_v9, %v321_v62 }
  0x5f   :  { %v143_v15 = vmul.f32 %v522_v13, %v128_v10  ;;  %v132_v16 = vmul.f32 %v128_v10, %v128_v10  ;;  %v172_v17 = vmul.f32 %v544_v24, %v156_v11  ;;  %v160_v19 = vmul.f32 %v156_v11, %v156_v11 }
  0x60   :  { %v203_v21 = vmul.f32 %v562_v32, %v187_v12  ;;  %v191_v22 = vmul.f32 %v187_v12, %v187_v12  ;;  %v234_v23 = vmul.f32 %v574_v38, %v218_v14  ;;  %v222_v25 = vmul.f32 %v218_v14, %v218_v14 }
  0x61   :  { %v333_v20 = vpop.eup %332  ;;  %v136_v28 = vsel %vm79_vm0, %v132_v16, 0.0  ;;  %v164_v30 = vsel %vm79_vm0, %v160_v19, 0.0 }
  0x62   :  { %v129_v26 = vmul.f32 %v333_v20, %v323_v63  ;;  %v157_v29 = vmul.f32 %v333_v20, %v325_v1  ;;  %v188_v13 = vmul.f32 %v333_v20, %v327_v2  ;;  %v195_v24 = vsel %vm79_vm0, %v191_v22, 0.0 }
  0x63   :  { %v219_v31 = vmul.f32 %v333_v20, %v329_v6  ;;  %v226_v32 = vsel %vm79_vm0, %v222_v25, 0.0 }
  0x64   :  { %v144_v33 = vmul.f32 %v528_v18, %v129_v26  ;;  %v133_v35 = vmul.f32 %v129_v26, %v129_v26  ;;  %v173_v36 = vmul.f32 %v550_v27, %v157_v29  ;;  %v161_v37 = vmul.f32 %v157_v29, %v157_v29 }
  0x65   :  { %v204_v38 = vmul.f32 %v564_v34, %v188_v13  ;;  %v192_v40 = vmul.f32 %v188_v13, %v188_v13  ;;  %v235_v41 = vmul.f32 %v576_v39, %v219_v31  ;;  %v223_v42 = vmul.f32 %v219_v31, %v219_v31 }
  0x66   :  { %v145_v43 = vadd.f32 %v144_v33, %v143_v15  ;;  %v137_v44 = vsel %vm79_vm0, %v133_v35, 0.0  ;;  %v174_v45 = vadd.f32 %v173_v36, %v172_v17  ;;  %v165_v46 = vsel %vm79_vm0, %v161_v37, 0.0 }
  0x67   :  { %v153_v47 = vadd.f32 %v137_v44, %v136_v28  ;;  %v184_v18 = vadd.f32 %v165_v46, %v164_v30  ;;  %v205_v48 = vadd.f32 %v204_v38, %v203_v21  ;;  %v196_v27 = vsel %vm79_vm0, %v192_v40, 0.0 }
  0x68   :  { %v215_v34 = vadd.f32 %v196_v27, %v195_v24  ;;  %v236_v49 = vadd.f32 %v235_v41, %v234_v23  ;;  %v227_v39 = vsel %vm79_vm0, %v223_v42, 0.0  ;;  %147 = vst [vmem:[#allocation7] sm:$0xff] %v145_v43  ;;  %176 = vst [vmem:[#allocation7 + $0x8] sm:$0xff] %v174_v45 }
  0x69   :  { %v246_v50 = vadd.f32 %v227_v39, %v226_v32  ;;  %155 = vst [vmem:[#allocation10] sm:$0xff] %v153_v47  ;;  %186 = vst [vmem:[#allocation10 + $0x8] sm:$0xff] %v184_v18 }
  0x6a   :  { %207 = vst [vmem:[#allocation7 + $0x10] sm:$0xff] %v205_v48  ;;  %217 = vst [vmem:[#allocation10 + $0x10] sm:$0xff] %v215_v34 }
  0x6b   :  { %238 = vst [vmem:[#allocation7 + $0x18] sm:$0xff] %v236_v49 }
  0x6c   :  { %411 = shalt.err (!%p408_p0)
}
  0x6d   :  { %s412_s7 = scalar_lea.hbm %s658_s2, 512 }
  0x6e   :  { %p413_p1 = scmp.ne.s32.totalorder %s658_s2, %s412_s7  ;;  %p416_p2 = scmp.lt.u32.totalorder %s412_s7, %s658_s2 }
  0x70   :  { %p418_p3 = pnand %p416_p2, %p413_p1 }
  0x72   :  { %421 = shalt.err (!%p418_p3)
}
  0x73   :  { %260 = dma.vmem_to_hbm [thread:$0]  %s255_s27, 512, %s658_s2, [#allocation4], %s453_s25, %s453_s25, %s454_s26   ;;  %248 = vst [vmem:[#allocation10 + $0x18] sm:$0xff] %v246_v50 }
  0x74   :  { %s422_s13 = scalar_lea.vmem %s619_s29, 512  ;;  %p427_p5 = scmp.lt.s32.totalorder %s619_s29, %s619_s29 }
  0x75   :  { %p423_p4 = scmp.ne.s32.totalorder %s619_s29, %s422_s13  ;;  %p428_p6 = scmp.lt.s32.totalorder %s422_s13, %s422_s13 }
  0x77   :  { %p429_p7 = por %p428_p6, %p427_p5 }
  0x79   :  { %p430_p8 = pnand %p429_p7, %p423_p4 }
  0x7b   :  { %433 = shalt.err (!%p430_p8)
}
  0x7c   :  { %s434_s15 = scalar_lea.hbm %s660_s4, 512 }
  0x7d   :  { %p435_p9 = scmp.ne.s32.totalorder %s660_s4, %s434_s15  ;;  %p438_p10 = scmp.lt.u32.totalorder %s434_s15, %s660_s4 }
  0x7f   :  { %p440_p11 = pnand %p438_p10, %p435_p9 }
  0x81   :  { %443 = shalt.err (!%p440_p11)
}
  0x82   :  { %284 = dma.vmem_to_hbm [thread:$0]  %s619_s29, 512, %s660_s4, [#allocation9], %s453_s25, %s453_s25, %s454_s26  }
  0x83   :  { %448 = dma.done.wait [#allocation4], 512  }
  0x84   :  { %449 = vsyncadd [#allocation4], 4294966784 }
  0x85   :  { %450 = dma.done.wait [#allocation9], 1024  }
  0x86   :  { %451 = vsyncadd [#allocation9], 4294966272 }
  0x87   :  { %294 = vsyncpa [#allocation3], 1 }
  0x88   :  { %295 = vsyncpa [#allocation6], 1 }
  0x89   :  { %296 = vsyncpa [#allocation4], 1 }
  0x8a   :  { %297 = vsyncpa [#allocation9], 1 }

</bundles_post_ra>
